<compile_context>
chip_gen: v6e
topology: v6e:2x2x1
jax: 0.10.0
libtpu: 0.0.40
codegen_flags: <defaults>
</compile_context>

<pallas_src>
import functools

import jax
import jax.numpy as jnp
import numpy as np
from jax.experimental import pallas as pl
from jax.experimental.pallas import tpu as pltpu

IGNORE_INDEX = 255
UPPER_BOUND = 1.0
NORM = False              # matches the module default
DEFAULT_TILE_HW = 16384   # lane-dense spatial tile (multiple of 128); sweepable
LANE = 128


def _loss_kernel(x_ref, t_ref, out_ref, counts_ref, s_ref, *,
                 hw, tile, upper_bound, norm):
    """Grid = (image i, spatial tile j).  Per-class partial sums accumulate in VMEM
    scratch across spatial tiles of one image; the per-image weights and loss are
    computed once on the last spatial step and written to that image's output slot."""
    j = pl.program_id(1)

    @pl.when(j == 0)
    def _():
        counts_ref[...] = jnp.zeros_like(counts_ref)
        s_ref[...] = jnp.zeros_like(s_ref)

    x = x_ref[0]                          # (C, T) logits tile, model dtype (f32 or bf16)
    C, T = x.shape

    # Ragged-tail handling (replaces the wrapper-side jnp.pad): the last tile may extend
    # past HW; those lanes hold undefined VMEM data and must be masked out.
    pos = jax.lax.broadcasted_iota(jnp.int32, (1, T), 1) + j * tile
    in_range = pos < hw                                               # (1, T) bool

    # Targets arrive in the caller's integer dtype; widen the (1,T) row and force
    # out-of-range lanes to IGNORE_INDEX so they never match any class.
    t = jnp.where(in_range, t_ref[0].astype(jnp.int32), IGNORE_INDEX)  # (1, T)

    class_ids = jax.lax.broadcasted_iota(jnp.int32, (C, T), 0)
    onehot = t == class_ids                                            # (C, T) bool

    # log-softmax over channels (sublane axis).  `sh` is reused for both the exp/lse
    # and the target gather - no separate `logp` temporary is materialized.
    m = jnp.max(x, axis=0, keepdims=True)                              # (1, T)
    sh = (x - m).astype(jnp.float32)                                   # (C, T) f32
    lse = jnp.log(jnp.sum(jnp.exp(sh), axis=0, keepdims=True))         # (1, T)

    # Per-pixel log-prob of the target class as a (1,T) row.  Masking the row with
    # in_range is required: garbage logits in the ragged tail can make lse NaN/inf and
    # 0*NaN would otherwise poison the accumulators (onehot alone is not enough).
    x_t = jnp.sum(jnp.where(onehot, sh, 0.0), axis=0, keepdims=True)   # (1, T)
    lp_t = jnp.where(in_range, x_t - lse, 0.0)                         # (1, T)

    # Per-class partial sums: lane (axis=-1) reductions only.
    # NOTE: contracting these on the MXU would require lp_t as a (T, k) operand, i.e. a
    # lane->sublane relayout of the whole row, which costs more than it saves at these C.
    onehot_f = onehot.astype(jnp.float32)                              # (C, T)
    counts_ref[...] += jnp.sum(onehot_f, axis=1, keepdims=True)        # (C, 1) pixel counts
    s_ref[...] += jnp.sum(onehot_f * lp_t, axis=1, keepdims=True)      # (C, 1) sum log p(tgt)

    @pl.when(j == pl.num_programs(1) - 1)
    def _():
        counts = counts_ref[...]                                       # (C, 1)
        s = s_ref[...]                                                 # (C, 1)
        total = jnp.sum(counts, keepdims=True)                         # (1, 1) valid pixels
        hist = counts / total                                          # density=True, unit bins
        if norm:
            w = jnp.where(hist != 0.0, upper_bound / hist, 0.0) + 1.0
        else:
            w = jnp.where(hist != 0.0, upper_bound * (1.0 - hist), 0.0) + 1.0
        num = jnp.sum(w * s, keepdims=True)                            # (1, 1)
        den = jnp.sum(w * counts, keepdims=True)                       # (1, 1)
        # TODO(synk): an all-IGNORE_INDEX image gives den == 0 -> NaN, identical to the
        # PyTorch reference; add a jnp.where(den > 0, ...) guard if such images can occur.
        out_ref[...] = (-(num / den)).reshape(1, 1, 1)


def image_based_ce_loss(logits, targets, *, num_classes,
                        upper_bound=UPPER_BOUND, norm=NORM,
                        tile_hw=DEFAULT_TILE_HW):
    """logits: (N, C, H, W) float (f32 or bf16); targets: (N, H, W) int (any int dtype,
    values in [0, C) or 255).  Returns the summed per-image weighted NLL loss (f32)."""
    N, C, H, W = logits.shape
    # The PyTorch reference histograms over num_classes bins == channel count of the head.
    assert C == num_classes, "kernel assumes logits channel count == num_classes"
    HW = H * W

    x = logits.reshape(N, C, HW)      # keep model dtype in HBM (bf16 halves input bytes)
    t = targets.reshape(N, 1, HW)     # keep caller's int dtype (uint8 OK) - no astype copy

    if HW < LANE:
        # Tiny-image fallback only (never hit for real segmentation inputs): pad the
        # spatial axis up to one lane group with inert IGNORE_INDEX pixels.
        pad = LANE - HW
        x = jnp.pad(x, ((0, 0), (0, 0), (0, pad)))
        t = jnp.pad(t, ((0, 0), (0, 0), (0, pad)), constant_values=IGNORE_INDEX)
        HW = LANE

    # Largest lane-dense tile <= tile_hw that does not exceed HW; the (possibly ragged)
    # last tile is masked in-kernel, so no wrapper-side padding of the big tensors.
    tile = max(LANE, (min(tile_hw, HW) // LANE) * LANE)
    n_tiles = pl.cdiv(HW, tile)

    kernel = functools.partial(_loss_kernel, hw=HW, tile=tile,
                               upper_bound=upper_bound, norm=norm)

    itemsize_x = jnp.dtype(x.dtype).itemsize
    itemsize_t = jnp.dtype(t.dtype).itemsize
    cost = pl.CostEstimate(
        flops=int(8 * N * C * HW),
        transcendentals=int(N * C * HW),
        bytes_accessed=int(N * C * HW * itemsize_x + N * HW * itemsize_t + N * 4),
    )

    per_image = pl.pallas_call(
        kernel,
        out_shape=jax.ShapeDtypeStruct((N, 1, 1), jnp.float32),
        grid_spec=pltpu.PrefetchScalarGridSpec(
            num_scalar_prefetch=0,
            grid=(N, n_tiles),
            in_specs=[
                pl.BlockSpec((1, C, tile), lambda i, j: (i, 0, j)),   # logits tile
                pl.BlockSpec((1, 1, tile), lambda i, j: (i, 0, j)),   # target tile
            ],
            out_specs=pl.BlockSpec((1, 1, 1), lambda i, j: (i, 0, 0)),
            scratch_shapes=[
                pltpu.VMEM((C, 1), jnp.float32),   # per-class pixel counts
                pltpu.VMEM((C, 1), jnp.float32),   # per-class sum of log p(target)
            ],
        ),
        compiler_params=pltpu.CompilerParams(
            # images independent -> "parallel"; spatial axis carries the accumulators.
            # TODO(synk): on v7x with N == 1, split the spatial axis across the two
            # TensorCores (per-core partial counts/s combined in the wrapper) so both
            # cores get work.
            dimension_semantics=("parallel", "arbitrary"),
            vmem_limit_bytes=32 * 1024 * 1024,
        ),
        cost_estimate=cost,
    )(x, t)

    return jnp.sum(per_image)


def _reference_loss(logits, targets, *, num_classes,
                    upper_bound=UPPER_BOUND, norm=NORM):
    """Pure numpy re-implementation of the PyTorch forward (per-image weighting)."""
    logits = np.asarray(logits, dtype=np.float64)
    targets = np.asarray(targets)
    N, C, H, W = logits.shape
    total = 0.0
    for i in range(N):
        t = targets[i]
        hist = np.histogram(t.flatten(), range(num_classes + 1), density=True)[0]
        if norm:
            w = (hist != 0) * upper_bound * (1.0 / np.where(hist != 0, hist, 1.0)) + 1
        else:
            w = (hist != 0) * upper_bound * (1 - hist) + 1
        x = logits[i]                                          # (C, H, W)
        m = x.max(axis=0, keepdims=True)
        logp = x - m - np.log(np.exp(x - m).sum(axis=0, keepdims=True))
        valid = (t != IGNORE_INDEX)
        tt = np.where(valid, t, 0)
        lp_t = np.take_along_axis(logp, tt[None], axis=0)[0]   # (H, W)
        w_t = w[tt] * valid
        total += -(w_t * lp_t * valid).sum() / w_t.sum()
    return total


if __name__ == "__main__":
    num_classes = 4
    # H*W = 360 -> two spatial tiles of 256 lanes with a ragged (masked) tail, so the
    # accumulation path and the in-kernel lane masking are both exercised.
    N, C, H, W = 2, num_classes, 18, 20

    key = jax.random.PRNGKey(0)
    k1, k2, k3 = jax.random.split(key, 3)
    logits = jax.random.normal(k1, (N, C, H, W), dtype=jnp.float32)
    labels = jax.random.randint(k2, (N, H, W), 0, num_classes, dtype=jnp.int32)
    ignore_mask = jax.random.uniform(k3, (N, H, W)) < 0.1
    targets = jnp.where(ignore_mask, IGNORE_INDEX, labels).astype(jnp.int32)

    loss = image_based_ce_loss(logits, targets, num_classes=num_classes)
    loss = jax.block_until_ready(loss)

    ref = _reference_loss(np.array(logits), np.array(targets), num_classes=num_classes)
    assert np.isfinite(float(loss))
    assert abs(float(loss) - float(ref)) < 1e-3, (float(loss), float(ref))

    print("KERNEL_OK")
</pallas_src>

<mosaic_0001>
module attributes {stable_mosaic.version = 11 : i64} {
  func.func @_loss_kernel(%arg0: i32, %arg1: i32, %arg2: memref<1x4x256xf32, #tpu.memory_space<vmem>>, %arg3: memref<1x1x256xi32, #tpu.memory_space<vmem>>, %arg4: memref<1x1x1xf32, #tpu.memory_space<vmem>>, %arg5: memref<4x1xf32, #tpu.memory_space<vmem>>, %arg6: memref<4x1xf32, #tpu.memory_space<vmem>>) attributes {dimension_semantics = [#tpu.dimension_semantics<parallel>, #tpu.dimension_semantics<arbitrary>], iteration_bounds = array<i64: 2, 2>, scalar_prefetch = 0 : i64, scratch_operands = 2 : i64, tpu.core_type = #tpu.core_type<tc>, window_params = [{transform_indices = @transform_0, window_bounds = array<i64: 1, 4, 256>}, {transform_indices = @transform_1, window_bounds = array<i64: 1, 1, 256>}, {transform_indices = @transform_2, window_bounds = array<i64: 1, 1, 1>}]} {
    %c0_i32 = arith.constant 0 : i32
    %0 = arith.cmpi eq, %arg1, %c0_i32 : i32
    %1 = arith.extui %0 : i1 to i32
    %c0_i32_0 = arith.constant 0 : i32
    %2 = arith.cmpi ne, %1, %c0_i32_0 : i32
    scf.if %2 {
      %cst_21 = arith.constant 0.000000e+00 : f32
      %50 = vector.broadcast %cst_21 : f32 to vector<4x1xf32>
      %c0_22 = arith.constant 0 : index
      %c0_23 = arith.constant 0 : index
      %51 = vector.load %arg5[%c0_22, %c0_23] : memref<4x1xf32, #tpu.memory_space<vmem>>, vector<4x1xf32>
      tpu.vector_store %arg5[%c0_22, %c0_23], %50 {strides = array<i32>} : memref<4x1xf32, #tpu.memory_space<vmem>>, vector<4x1xf32>,
      %cst_24 = arith.constant 0.000000e+00 : f32
      %52 = vector.broadcast %cst_24 : f32 to vector<4x1xf32>
      %c0_25 = arith.constant 0 : index
      %c0_26 = arith.constant 0 : index
      %53 = vector.load %arg6[%c0_25, %c0_26] : memref<4x1xf32, #tpu.memory_space<vmem>>, vector<4x1xf32>
      tpu.vector_store %arg6[%c0_25, %c0_26], %52 {strides = array<i32>} : memref<4x1xf32, #tpu.memory_space<vmem>>, vector<4x1xf32>,
    } else {
    }
    %c0 = arith.constant 0 : index
    %c0_1 = arith.constant 0 : index
    %c0_2 = arith.constant 0 : index
    %3 = vector.load %arg2[%c0, %c0_1, %c0_2] : memref<1x4x256xf32, #tpu.memory_space<vmem>>, vector<1x4x256xf32>
    %4 = vector.shape_cast %3 : vector<1x4x256xf32> to vector<4x256xf32>
    %5 = tpu.iota {dimensions = array<i32: 1>} : vector<1x256xi32>
    %c256_i32 = arith.constant 256 : i32
    %6 = arith.muli %arg1, %c256_i32 : i32
    %7 = vector.broadcast %6 : i32 to vector<1x256xi32>
    %8 = arith.addi %5, %7 : vector<1x256xi32>
    %c360_i32 = arith.constant 360 : i32
    %9 = vector.broadcast %c360_i32 : i32 to vector<1x256xi32>
    %10 = arith.cmpi slt, %8, %9 : vector<1x256xi32>
    %c0_3 = arith.constant 0 : index
    %c0_4 = arith.constant 0 : index
    %c0_5 = arith.constant 0 : index
    %11 = vector.load %arg3[%c0_3, %c0_4, %c0_5] : memref<1x1x256xi32, #tpu.memory_space<vmem>>, vector<1x1x256xi32>
    %12 = vector.shape_cast %11 : vector<1x1x256xi32> to vector<1x256xi32>
    %c255_i32 = arith.constant 255 : i32
    %13 = vector.broadcast %c255_i32 : i32 to vector<1x256xi32>
    %14 = arith.select %10, %12, %13 : vector<1x256xi1>, vector<1x256xi32>
    %15 = tpu.iota {dimensions = array<i32: 0>} : vector<4x256xi32>
    %16 = vector.broadcast %14 : vector<1x256xi32> to vector<4x256xi32>
    %17 = arith.cmpi eq, %16, %15 : vector<4x256xi32>
    %cst = arith.constant dense<0xFF800000> : vector<256xf32>
    %18 = vector.multi_reduction <maximumf>, %4, %cst [0] : vector<4x256xf32> to vector<256xf32>
    %19 = vector.shape_cast %18 : vector<256xf32> to vector<1x256xf32>
    %20 = vector.broadcast %19 : vector<1x256xf32> to vector<4x256xf32>
    %21 = arith.subf %4, %20 : vector<4x256xf32>
    %22 = math.exp %21 : vector<4x256xf32>
    %cst_6 = arith.constant dense<0.000000e+00> : vector<256xf32>
    %23 = vector.multi_reduction <add>, %22, %cst_6 [0] : vector<4x256xf32> to vector<256xf32>
    %24 = vector.shape_cast %23 : vector<256xf32> to vector<1x256xf32>
    %25 = math.log %24 : vector<1x256xf32>
    %cst_7 = arith.constant 0.000000e+00 : f32
    %26 = vector.broadcast %cst_7 : f32 to vector<4x256xf32>
    %27 = arith.select %17, %21, %26 : vector<4x256xi1>, vector<4x256xf32>
    %cst_8 = arith.constant dense<0.000000e+00> : vector<256xf32>
    %28 = vector.multi_reduction <add>, %27, %cst_8 [0] : vector<4x256xf32> to vector<256xf32>
    %29 = vector.shape_cast %28 : vector<256xf32> to vector<1x256xf32>
    %30 = arith.subf %29, %25 : vector<1x256xf32>
    %cst_9 = arith.constant 0.000000e+00 : f32
    %31 = vector.broadcast %cst_9 : f32 to vector<1x256xf32>
    %32 = arith.select %10, %30, %31 : vector<1x256xi1>, vector<1x256xf32>
    %33 = arith.extui %17 : vector<4x256xi1> to vector<4x256xi32>
    %34 = arith.sitofp %33 : vector<4x256xi32> to vector<4x256xf32>
    %c0_10 = arith.constant 0 : index
    %c0_11 = arith.constant 0 : index
    %35 = vector.load %arg5[%c0_10, %c0_11] : memref<4x1xf32, #tpu.memory_space<vmem>>, vector<4x1xf32>
    %cst_12 = arith.constant dense<0.000000e+00> : vector<4xf32>
    %36 = vector.multi_reduction <add>, %34, %cst_12 [1] : vector<4x256xf32> to vector<4xf32>
    %37 = vector.shape_cast %36 : vector<4xf32> to vector<4x1xf32>
    %38 = arith.addf %35, %37 : vector<4x1xf32>
    %c0_13 = arith.constant 0 : index
    %c0_14 = arith.constant 0 : index
    %39 = vector.load %arg5[%c0_13, %c0_14] : memref<4x1xf32, #tpu.memory_space<vmem>>, vector<4x1xf32>
    tpu.vector_store %arg5[%c0_13, %c0_14], %38 {strides = array<i32>} : memref<4x1xf32, #tpu.memory_space<vmem>>, vector<4x1xf32>,
    %c0_15 = arith.constant 0 : index
    %c0_16 = arith.constant 0 : index
    %40 = vector.load %arg6[%c0_15, %c0_16] : memref<4x1xf32, #tpu.memory_space<vmem>>, vector<4x1xf32>
    %41 = vector.broadcast %32 : vector<1x256xf32> to vector<4x256xf32>
    %42 = arith.mulf %34, %41 : vector<4x256xf32>
    %cst_17 = arith.constant dense<0.000000e+00> : vector<4xf32>
    %43 = vector.multi_reduction <add>, %42, %cst_17 [1] : vector<4x256xf32> to vector<4xf32>
    %44 = vector.shape_cast %43 : vector<4xf32> to vector<4x1xf32>
    %45 = arith.addf %40, %44 : vector<4x1xf32>
    %c0_18 = arith.constant 0 : index
    %c0_19 = arith.constant 0 : index
    %46 = vector.load %arg6[%c0_18, %c0_19] : memref<4x1xf32, #tpu.memory_space<vmem>>, vector<4x1xf32>
    tpu.vector_store %arg6[%c0_18, %c0_19], %45 {strides = array<i32>} : memref<4x1xf32, #tpu.memory_space<vmem>>, vector<4x1xf32>,
    %c1_i32 = arith.constant 1 : i32
    %47 = arith.cmpi eq, %arg1, %c1_i32 : i32
    %48 = arith.extui %47 : i1 to i32
    %c0_i32_20 = arith.constant 0 : i32
    %49 = arith.cmpi ne, %48, %c0_i32_20 : i32
    scf.if %49 {
      %c0_21 = arith.constant 0 : index
      %c0_22 = arith.constant 0 : index
      %50 = vector.load %arg5[%c0_21, %c0_22] : memref<4x1xf32, #tpu.memory_space<vmem>>, vector<4x1xf32>
      %c0_23 = arith.constant 0 : index
      %c0_24 = arith.constant 0 : index
      %51 = vector.load %arg6[%c0_23, %c0_24] : memref<4x1xf32, #tpu.memory_space<vmem>>, vector<4x1xf32>
      %52 = vector.shape_cast %50 : vector<4x1xf32> to vector<1x4x1xf32>
      %cst_25 = arith.constant dense<0.000000e+00> : vector<1xf32>
      %53 = vector.multi_reduction <add>, %52, %cst_25 [1, 2] : vector<1x4x1xf32> to vector<1xf32>
      %54 = vector.shape_cast %53 : vector<1xf32> to vector<1x1x1xf32>
      %55 = vector.extract %54[0, 0, 0] : f32 from vector<1x1x1xf32>
      %56 = vector.broadcast %55 : f32 to vector<1x1xf32>
      %57 = vector.broadcast %56 : vector<1x1xf32> to vector<4x1xf32>
      %58 = arith.divf %50, %57 : vector<4x1xf32>
      %cst_26 = arith.constant 0.000000e+00 : f32
      %59 = vector.broadcast %cst_26 : f32 to vector<4x1xf32>
      %60 = arith.cmpf one, %58, %59 : vector<4x1xf32>
      %cst_27 = arith.constant 1.000000e+00 : f32
      %61 = vector.broadcast %cst_27 : f32 to vector<4x1xf32>
      %62 = arith.subf %61, %58 : vector<4x1xf32>
      %cst_28 = arith.constant 1.000000e+00 : f32
      %63 = vector.broadcast %cst_28 : f32 to vector<4x1xf32>
      %64 = arith.mulf %63, %62 : vector<4x1xf32>
      %cst_29 = arith.constant 0.000000e+00 : f32
      %65 = vector.broadcast %cst_29 : f32 to vector<4x1xf32>
      %66 = arith.select %60, %64, %65 : vector<4x1xi1>, vector<4x1xf32>
      %cst_30 = arith.constant 1.000000e+00 : f32
      %67 = vector.broadcast %cst_30 : f32 to vector<4x1xf32>
      %68 = arith.addf %66, %67 : vector<4x1xf32>
      %69 = arith.mulf %68, %51 : vector<4x1xf32>
      %70 = vector.shape_cast %69 : vector<4x1xf32> to vector<1x4x1xf32>
      %cst_31 = arith.constant dense<0.000000e+00> : vector<1xf32>
      %71 = vector.multi_reduction <add>, %70, %cst_31 [1, 2] : vector<1x4x1xf32> to vector<1xf32>
      %72 = vector.shape_cast %71 : vector<1xf32> to vector<1x1x1xf32>
      %73 = vector.extract %72[0, 0, 0] : f32 from vector<1x1x1xf32>
      %74 = vector.broadcast %73 : f32 to vector<1x1xf32>
      %75 = arith.mulf %68, %50 : vector<4x1xf32>
      %76 = vector.shape_cast %75 : vector<4x1xf32> to vector<1x4x1xf32>
      %cst_32 = arith.constant dense<0.000000e+00> : vector<1xf32>
      %77 = vector.multi_reduction <add>, %76, %cst_32 [1, 2] : vector<1x4x1xf32> to vector<1xf32>
      %78 = vector.shape_cast %77 : vector<1xf32> to vector<1x1x1xf32>
      %79 = vector.extract %78[0, 0, 0] : f32 from vector<1x1x1xf32>
      %80 = vector.broadcast %79 : f32 to vector<1x1xf32>
      %81 = arith.divf %74, %80 : vector<1x1xf32>
      %cst_33 = arith.constant 0.000000e+00 : f32
      %82 = vector.broadcast %cst_33 : f32 to vector<1x1xf32>
      %83 = arith.subf %82, %81 : vector<1x1xf32>
      %84 = vector.shape_cast %83 : vector<1x1xf32> to vector<1x1x1xf32>
      %c0_34 = arith.constant 0 : index
      %c0_35 = arith.constant 0 : index
      %c0_36 = arith.constant 0 : index
      %85 = vector.load %arg4[%c0_34, %c0_35, %c0_36] : memref<1x1x1xf32, #tpu.memory_space<vmem>>, vector<1x1x1xf32>
      tpu.vector_store %arg4[%c0_34, %c0_35, %c0_36], %84 {strides = array<i32>} : memref<1x1x1xf32, #tpu.memory_space<vmem>>, vector<1x1x1xf32>,
    } else {
    }
    return
  }
  func.func @transform_0(%arg0: i32, %arg1: i32) -> (i32, i32, i32) {
    %c0_i32 = arith.constant 0 : i32
    %c0_i32_0 = arith.constant 0 : i32
    return %arg0, %c0_i32, %arg1 : i32, i32, i32
  }
  func.func @transform_1(%arg0: i32, %arg1: i32) -> (i32, i32, i32) {
    %c0_i32 = arith.constant 0 : i32
    %c0_i32_0 = arith.constant 0 : i32
    return %arg0, %c0_i32, %arg1 : i32, i32, i32
  }
  func.func @transform_2(%arg0: i32, %arg1: i32) -> (i32, i32, i32) {
    %c0_i32 = arith.constant 0 : i32
    %c0_i32_0 = arith.constant 0 : i32
    %c0_i32_1 = arith.constant 0 : i32
    return %arg0, %c0_i32, %c0_i32_0 : i32, i32, i32
  }
}

</mosaic_0001>

<bundles_post_ra>
// kernel: tpu_custom_call.1
= control target key start
LH: loop header
LB: loop body
LE: loop exit
PB: predicated region body
PF: predicated region fallthrough
CT: control target
= control target key end

     0   :  { %7 = vsyncpa [#allocation5], 0  ;;  %s995_s0 = inlined_call_operand.hbm [shape: f32[2,4,360], index: 0, kind: input, shape index: {}]   ;;  %s996_s1 = inlined_call_operand.hbm [shape: s32[2,1,360], index: 1, kind: input, shape index: {}]   ;;  %s997_s2 = inlined_call_operand.vmem [shape: f32[2,1,1], index: 2, kind: output, shape index: {}]  }
   0x1   :  { %9 = vsyncpa [#allocation5 + $0x1], 0 }
   0x2   :  { %10 = vsyncpa [#allocation7], 0 }
   0x3   :  { %12 = vsyncpa [#allocation7 + $0x1], 0  ;;  %s776_s9 = smov 0   ;;  %s778_s10 = smov 0  }
   0x4   :  { %s780_s11 = smov 0   ;;  %s782_s12 = smov 0  }
   0x5   :  { %s784_s13 = smov 0   ;;  %s786_s14 = smov 0  }
   0x6   :  { %s788_s15 = smov 0   ;;  %s790_s16 = smov 0  }
   0x7 LB: > { %s27_s17 = sadd.s32 1, %s747_s14  ;;  %s30_s18 = sadd.s32 1, %s751_s15  ;;  %s755_s16 = sphi %s790_s16, %s18_s16   ;;  %s751_s15 = sphi %s788_s15, %s1010_s15   ;;  %s747_s14 = sphi %s786_s14, %s1009_s14   ;;  %s743_s13 = sphi %s784_s13, %s1008_s13   ;;  %s739_s12 = sphi %s782_s12, %s1007_s12   ;;  %s735_s11 = sphi %s780_s11, %s1006_s11   ;;  %s731_s10 = sphi %s778_s10, %s1005_s10   ;;  %s727_s9 = sphi %s776_s9, %s1004_s9  }
   0x8   : > { %p28_p0 = scmp.ge.s32.totalorder %s27_s17, 2  ;;  %s520_s19 = sadd.s32 4294967295, %s755_s16  }
   0x9   : > { %p46_p1 = scmp.ne.s32.totalorder %s735_s11, %s731_s10  ;;  %p47_p2 = scmp.eq.s32.totalorder %s755_s16, 0 }
   0xa   : > { %s1012_s17 = smov (%p28_p0, %s27_s17), 0  ;;  %s1014_s18 = smov (!%p28_p0, %s30_s18), %s751_s15 }
   0xb   : > { %s35_s20 = ssub.s32 %s747_s14, %s1012_s17  ;;  %p32_p3 = scmp.ge.s32.totalorder %s1014_s18, 2 }
   0xc   : > { %p52_p4 = scmp.ne.s32.totalorder %s731_s10, %s727_s9  ;;  %p826_p5 = por %p47_p2, %p46_p1 }
   0xd   : > { %p53_p6 = scmp.eq.s32.totalorder %s520_s19, 0  ;;  %s1016_s18 = smov (%p32_p3, %s1014_s18), 0 }
   0xe   : > { %s34_s23 = ssub.s32 %s751_s15, %s1016_s18  ;;  %s39_s25 = sadd.s32 1, %s735_s11 }
   0xf   : > { %p832_p7 = por %p53_p6, %p52_p4  ;;  %s36_s24 = sor.u32 %s35_s20, %s34_s23 }
  0x10   : > { %p37_p8 = scmp.eq.s32.totalorder %s36_s24, 0  ;;  %p523_p9 = scmp.ge.s32.totalorder %s755_s16, 4 }
  0x12   : > { %s840_s26 = scalar_select %p37_p8, %s735_s11, %s39_s25  }
  0x13   : > { %126 = sbr.rel (%p523_p9) target bundleno = 92 (0x5c), region = 16 }
  0x18   : > { %129 = sbr.rel (!%p826_p5) target bundleno = 58 (0x3a), region = 20  ;;  %s130_s27 = sand.u32 (%p826_p5), 1, %s735_s11  }
  0x19   : > { %s525_s28 = sshll.u32 (%p826_p5), %s747_s14, 1  ;;  %s524_s29 = sshll.u32 (%p826_p5), %s130_s27, 3 }
  0x1a   : > { %s136_s30 = ssub.s32 (%p826_p5), 3, %s525_s28  ;;  %s850_s5 = scalar_lea.sflag (%p826_p5), [#allocation5], %s130_s27 }
  0x1b   : > { %p137_p10 = scmp.lt.s32.totalorder (%p826_p5), %s136_s30, 2  ;;  %s134_s6 = scalar_lea.vmem (%p826_p5), [#allocation4], %s524_s29 }
  0x1d   : > { %s1018_s30 = smov (!%p137_p10, %s136_s30), 2 }
  0x1e   : > { %s847_s3 = sshll.u32 %s1018_s30, 6 }
  0x1f   : > { %s141_s4 = ssub.s32 128, %s847_s3 }
  0x20   : > { %142 = vsyncadd %s850_s5, %s141_s4  ;;  %s546_s7 = smul.u32 3, %s751_s15  ;;  %p527_p11 = scmp.ne.s32.totalorder %s847_s3, 0 }
  0x21   : > { %s150_s8 = sshll.u32 %s134_s6, 4  ;;  %s637_s30 = scalar_lea.hbm %s995_s0, 384  ;;  %s151_s8 = int_to_ptr.vmem [resolvable:$true] %s150_s8 }
  0x22   : > { %s145_s9 = sadd.s32 %s546_s7, %s525_s28 }
  0x23   : > { %s528_s19 = sshll.u32 %s145_s9, 6 }
  0x24   : > { %s147_s24 = scalar_lea.hbm %s995_s0, %s528_s19 }
  0x25   : > { %s633_s25 = scalar_lea.hbm %s147_s24, %s847_s3 }
  0x26   : > { %p634_p12 = scmp.ne.s32.totalorder %s147_s24, %s633_s25  ;;  %p639_p1 = scmp.lt.s32.totalorder %s637_s30, %s633_s25 }
  0x28   : > { %p635_p13 = pnand %p634_p12, %p527_p11 }
  0x2a   : > { %p636_p0 = pneg %p635_p13 }
  0x2c   : > { %p641_p2 = pnand %p639_p1, %p636_p0 }
  0x2e   : > { %644 = shalt.err (!%p641_p2)
}
  0x2f   : > { %s645_s28 = scalar_lea.vmem %s151_s8, %s847_s3  ;;  %s757_s4 = smov [#allocation4]  }
  0x30   : > { %p646_p3 = scmp.ne.s32.totalorder %s151_s8, %s645_s28  ;;  %s649_s6 = sshll.u32 %s757_s4, 4  ;;  %s650_s6 = int_to_ptr.vmem [resolvable:$false] %s649_s6 }
  0x31   : > { %s651_s7 = scalar_lea.vmem %s650_s6, 256  ;;  %p652_p8 = scmp.lt.s32.totalorder %s151_s8, %s650_s6 }
  0x32   : > { %p647_p4 = pnand %p646_p3, %p527_p11  ;;  %p653_p9 = scmp.lt.s32.totalorder %s651_s7, %s645_s28 }
  0x34   : > { %p648_p6 = pneg %p647_p4  ;;  %p654_p10 = por %p653_p9, %p652_p8 }
  0x36   : > { %p655_p12 = pnand %p654_p10, %p648_p6 }
  0x38   : > { %658 = shalt.err (!%p655_p12)
}
  0x39   : > { %153 = dma.hbm_to_vmem [thread:$0]  (%p527_p11), %s147_s24, %s847_s3, %s151_s8, %s850_s5  }
  0x3a PF: > { %156 = sbr.rel (!%p826_p5) target bundleno = 92 (0x5c), region = 24  ;;  %s157_s9 = sand.u32 (%p826_p5), 1, %s735_s11  }
  0x3b   : > { %s532_s19 = sshll.u32 (%p826_p5), %s747_s14, 1  ;;  %s531_s20 = sshll.u32 (%p826_p5), %s157_s9, 1 }
  0x3c   : > { %s163_s23 = ssub.s32 (%p826_p5), 3, %s532_s19  ;;  %s878_s29 = scalar_lea.sflag (%p826_p5), [#allocation7], %s157_s9 }
  0x3d   : > { %p164_p13 = scmp.lt.s32.totalorder (%p826_p5), %s163_s23, 2  ;;  %s161_s3 = scalar_lea.vmem (%p826_p5), [#allocation6], %s531_s20 }
  0x3f   : > { %s1020_s23 = smov (!%p164_p13, %s163_s23), 2 }
  0x40   : > { %s875_s25 = sshll.u32 %s1020_s23, 4 }
  0x41   : > { %s168_s27 = ssub.s32 32, %s875_s25 }
  0x42   : > { %169 = vsyncadd %s878_s29, %s168_s27  ;;  %s547_s21 = smul.u32 3, %s751_s15  ;;  %p534_p5 = scmp.ne.s32.totalorder %s875_s25, 0 }
  0x43   : > { %s176_s5 = sshll.u32 %s161_s3, 4  ;;  %s663_s20 = scalar_lea.hbm %s996_s1, 96  ;;  %s177_s5 = int_to_ptr.vmem [resolvable:$true] %s176_s5 }
  0x44   : > { %s172_s8 = sadd.s32 %s547_s21, %s532_s19 }
  0x45   : > { %s535_s24 = sshll.u32 %s172_s8, 4 }
  0x46   : > { %s174_s4 = scalar_lea.hbm %s996_s1, %s535_s24 }
  0x47   : > { %s659_s6 = scalar_lea.hbm %s174_s4, %s875_s25 }
  0x48   : > { %p660_p11 = scmp.ne.s32.totalorder %s174_s4, %s659_s6  ;;  %p665_p2 = scmp.lt.s32.totalorder %s663_s20, %s659_s6 }
  0x4a   : > { %p661_p0 = pnand %p660_p11, %p534_p5 }
  0x4c   : > { %p662_p1 = pneg %p661_p0 }
  0x4e   : > { %p667_p3 = pnand %p665_p2, %p662_p1 }
  0x50   : > { %670 = shalt.err (!%p667_p3)
}
  0x51   : > { %s671_s19 = scalar_lea.vmem %s177_s5, %s875_s25  ;;  %s758_s23 = smov [#allocation6]  }
  0x52   : > { %p672_p4 = scmp.ne.s32.totalorder %s177_s5, %s671_s19  ;;  %s675_s27 = sshll.u32 %s758_s23, 4  ;;  %s676_s27 = int_to_ptr.vmem [resolvable:$false] %s675_s27 }
  0x53   : > { %s677_s3 = scalar_lea.vmem %s676_s27, 64  ;;  %p678_p9 = scmp.lt.s32.totalorder %s177_s5, %s676_s27 }
  0x54   : > { %p673_p6 = pnand %p672_p4, %p534_p5  ;;  %p679_p10 = scmp.lt.s32.totalorder %s677_s3, %s671_s19 }
  0x56   : > { %p674_p8 = pneg %p673_p6  ;;  %p680_p12 = por %p679_p10, %p678_p9 }
  0x58   : > { %p681_p13 = pnand %p680_p12, %p674_p8 }
  0x5a   : > { %684 = shalt.err (!%p681_p13)
}
  0x5b   : > { %179 = dma.hbm_to_vmem [thread:$0]  (%p534_p5), %s174_s4, %s875_s25, %s177_s5, %s878_s29  }
  0x5c PF: > { %p536_p11 = scmp.ge.s32.totalorder %s755_s16, 1  ;;  %p181_p0 = scmp.lt.s32.totalorder %s755_s16, 5 }
  0x5e   : > { %p182_p1 = pnand %p536_p11, %p181_p0 }
  0x5f   : > { %s187_s21 = sand.u32 (!%p182_p1), 1, %s731_s10  }
  0x60   : > { %185 = sbr.rel (%p182_p1) target bundleno = 779 (0x30b), region = 28  ;;  %s537_s8 = sshll.u32 (!%p182_p1), %s187_s21, 3 }
  0x61   : > { %s188_s24 = scalar_lea.sflag (!%p182_p1), [#allocation5], %s187_s21  ;;  %s191_s30 = scalar_lea.vmem (!%p182_p1), [#allocation4], %s537_s8 }
  0x65   : > { %718 = dma.done.wait (%p832_p7), %s188_s24, 128  }
  0x66   : > { %720 = vsyncadd (%p832_p7), %s188_s24, 4294967168  ;;  %s538_s25 = sshll.u32 %s187_s21, 1  ;;  %s197_s29 = scalar_lea.sflag [#allocation7], %s187_s21 }
  0x67   : > { %s200_s5 = scalar_lea.vmem [#allocation6], %s538_s25 }
  0x68   : > { %722 = dma.done.wait (%p832_p7), %s197_s29, 32  }
  0x69   : > { %724 = vsyncadd (%p832_p7), %s197_s29, 4294967264  ;;  %p234_p5 = scmp.lt.s32.totalorder %s743_s13, 1  ;;  %p539_p2 = scmp.ne.s32.totalorder %s739_s12, 0 }
  0x6b   : > { %s1022_s13 = smov (!%p234_p5, %s743_s13), 1  ;;  %240 = sbr.rel (%p539_p2) target bundleno = 114 (0x72), region = 40 }
  0x6c   : > { %s236_s6 = scalar_lea.vmem %s997_s2, %s1022_s13 }
  0x70   : > { %vm241_vm0 = vcmask 3072   ;;  %v759_v0 = vmov 0.0  }
  0x71   : > { %242 = vst.msk [vmem:[#allocation2] sm:$0xf] %vm241_vm0, %v759_v0  ;;  %243 = vst.msk [vmem:[#allocation3] sm:$0xf] %vm241_vm0, %v759_v0 }
  0x72 PF: > { %v245_v1 = vlaneseq  ;;  %s540_s22 = sshll.u32 %s739_s12, 8  ;;  %vm280_vm1 = vcmask 1043456   ;;  %v244_v2 = vld [vmem:[%s191_s30] sm:$0xff]  ;;  %v254_v9 = vld [vmem:[%s200_s5] sm:$0x3]  ;;  %v760_v32 = vmov 0.0  }
  0x73   : > { %v249_v3 = vstv %s540_s22  ;;  %v278_v4 = vcombine.high %v244_v2, %v244_v2  ;;  %v281_v5 = vsel %vm280_vm1, %v244_v2, -inf  ;;  %vm357_vm6 = vcmask 3072   ;;  %p543_p7 = scmp.ne.s32.totalorder %s739_s12, 1 }
  0x74   : > { %v246_v6 = vand.u32 127, %v245_v1  ;;  %v256_v7 = vshrl.u32 %v245_v1, 7  ;;  %v282_v8 = vrot.slane %v281_v5, 4 }
  0x75   : > { %v288_v10 = vsel %vm280_vm1, %v278_v4, -inf }
  0x76   : > { %v247_v11 = vadd.s32 128, %v246_v6  ;;  %v922_v12 = vadd.s32 %v249_v3, %v246_v6  ;;  %v257_v13 = vsub.s32 0, %v256_v7  ;;  %v261_v14 = vsub.s32 1, %v256_v7 }
  0x77   : > { %v283_v15 = vmax.f32 %v281_v5, %v282_v8  ;;  %v289_v16 = vrot.slane %v288_v10, 4 }
  0x78   : > { %v924_v17 = vadd.s32 %v249_v3, %v247_v11  ;;  %vm252_vm2 = vcmp.lt.s32.totalorder %v922_v12, 360  ;;  %v258_v18 = vrot.slane %v254_v9, %v257_v13  ;;  %v262_v19 = vrot.slane %v254_v9, %v261_v14  ;;  %v350_v28 = vld [vmem:[#allocation2] sm:$0xf]  ;;  %v359_v31 = vld [vmem:[#allocation3] sm:$0xf] }
  0x79   : > { %v284_v20 = vrot.slane %v283_v15, 2  ;;  %v290_v21 = vmax.f32 %v288_v10, %v289_v16 }
  0x7a   : > { %vm253_vm3 = vcmp.lt.s32.totalorder %v924_v17, 360  ;;  %v263_v22 = vsel %vm252_vm2, %v258_v18, 255 }
  0x7b   : > { %v264_v23 = vsel %vm253_vm3, %v262_v19, 255  ;;  %v270_v24 = vrot.slane %v263_v22, %v257_v13  ;;  %v285_v25 = vmax.f32 %v283_v15, %v284_v20  ;;  %v291_v26 = vrot.slane %v290_v21, 2 }
  0x7c   : > { %v274_v27 = vrot.slane %v264_v23, %v257_v13 }
  0x7d   : > { %vm932_vm4 = vcmp.eq.s32.totalorder %v270_v24, %v256_v7  ;;  %v286_v29 = vrot.slane %v285_v25, 1  ;;  %v292_v30 = vmax.f32 %v290_v21, %v291_v26 }
  0x7e   : > { %vm936_vm5 = vcmp.eq.s32.totalorder %v274_v27, %v256_v7  ;;  %v541_v33 = vsel %vm932_vm4, 1.0, %v760_v32 }
  0x7f   : > { %v542_v34 = vsel %vm936_vm5, 1.0, %v760_v32  ;;  %v351_v35 = vsel %vm280_vm1, %v541_v33, 0.0  ;;  %v287_v36 = vmax.f32 %v285_v25, %v286_v29  ;;  %v293_v37 = vrot.slane %v292_v30, 1 }
  0x80   : > { %v352_v38 = vsel %vm280_vm1, %v542_v34, 0.0 }
  0x81   : > { %v353_v39 = vadd.f32 %v352_v38, %v351_v35  ;;  %v294_v40 = vmax.f32 %v292_v30, %v293_v37 }
  0x83   : > { %354 = vadd.xlane.f32.xlu0 %v353_v39  ;;  %v297_v41 = vcombine.low %v287_v36, %v294_v40 }
  0x85   : > { %v299_v42 = vsub.f32 %v244_v2, %v297_v41 }
  0x87   : > { %v300_v43 = vmul.f32 1.442695, %v299_v42  ;;  %v324_v44 = vcombine.high %v299_v42, %v299_v42  ;;  %v326_v46 = vsel %vm932_vm4, %v299_v42, 0.0 }
  0x88   : > { %v328_v52 = vsel %vm280_vm1, %v326_v46, 0.0 }
  0x89   : > { %623 = vpow2.f32 %v300_v43  ;;  %v327_v50 = vsel %vm936_vm5, %v324_v44, 0.0  ;;  %v329_v58 = vrot.slane %v328_v52, 4 }
  0x8a   : > { %v335_v55 = vsel %vm280_vm1, %v327_v50, 0.0 }
  0x8b   : > { %v336_v61 = vrot.slane %v335_v55, 4  ;;  %v330_v0 = vadd.f32 %v329_v58, %v328_v52 }
  0x8d   : > { %v337_v3 = vadd.f32 %v336_v61, %v335_v55  ;;  %v331_v5 = vrot.slane %v330_v0, 2 }
  0x8f   : > { %v338_v6 = vrot.slane %v337_v3, 2  ;;  %v332_v7 = vadd.f32 %v331_v5, %v330_v0 }
  0x91   : > { %v339_v8 = vadd.f32 %v338_v6, %v337_v3  ;;  %v333_v9 = vrot.slane %v332_v7, 1 }
  0x93   : > { %v340_v10 = vrot.slane %v339_v8, 1  ;;  %v334_v11 = vadd.f32 %v333_v9, %v332_v7 }
  0x95   : > { %v341_v15 = vadd.f32 %v340_v10, %v339_v8 }
  0x96   : > { %v624_v45 = vpop.eup %623 }
  0x97   : > { %v303_v47 = vcombine.high %v624_v45, %v624_v45  ;;  %v305_v48 = vsel %vm280_vm1, %v624_v45, 0.0 }
  0x98   : > { %v306_v49 = vrot.slane %v305_v48, 4 }
  0x99   : > { %v312_v51 = vsel %vm280_vm1, %v303_v47, 0.0 }
  0x9a   : > { %v307_v53 = vadd.f32 %v306_v49, %v305_v48  ;;  %v313_v54 = vrot.slane %v312_v51, 4 }
  0x9c   : > { %v308_v56 = vrot.slane %v307_v53, 2  ;;  %v314_v57 = vadd.f32 %v313_v54, %v312_v51 }
  0x9e   : > { %v309_v59 = vadd.f32 %v308_v56, %v307_v53  ;;  %v315_v60 = vrot.slane %v314_v57, 2 }
  0xa0   : > { %v310_v62 = vrot.slane %v309_v59, 1  ;;  %v316_v63 = vadd.f32 %v315_v60, %v314_v57 }
  0xa2   : > { %v311_v1 = vadd.f32 %v310_v62, %v309_v59  ;;  %v317_v2 = vrot.slane %v316_v63, 1 }
  0xa4   : > { %v318_v4 = vadd.f32 %v317_v2, %v316_v63  ;;  %625 = vlog2.f32 %v311_v1 }
  0xa6   : > { %627 = vlog2.f32 %v318_v4 }
  0xb1   : > { %v626_v13 = vpop.eup %625 }
  0xb2   : > { %v320_v14 = vmul.f32 0.6931472, %v626_v13 }
  0xb3   : > { %v628_v16 = vpop.eup %627 }
  0xb4   : > { %v322_v18 = vmul.f32 0.6931472, %v628_v16  ;;  %v342_v19 = vsub.f32 %v334_v11, %v320_v14 }
  0xb6   : > { %v343_v20 = vsub.f32 %v341_v15, %v322_v18  ;;  %v344_v21 = vsel %vm252_vm2, %v342_v19, 0.0 }
  0xb7   : > { %v360_v22 = vmul.f32 %v541_v33, %v344_v21 }
  0xb8   : > { %v345_v23 = vsel %vm253_vm3, %v343_v20, 0.0 }
  0xb9   : > { %v361_v24 = vmul.f32 %v542_v34, %v345_v23  ;;  %v362_v25 = vsel %vm280_vm1, %v360_v22, 0.0 }
  0xbb   : > { %v363_v26 = vsel %vm280_vm1, %v361_v24, 0.0 }
  0xbc   : > { %v364_v27 = vadd.f32 %v363_v26, %v362_v25 }
  0xbe   : > { %365 = vadd.xlane.f32.xlu0 %v364_v27 }
 0x10c   : > { %v355_v29 = vpop.xlane.xlu0 %354 }
 0x10d   : > { %v356_v30 = vadd.f32 %v355_v29, %v350_v28 }
 0x10f   : > { %358 = vst.msk [vmem:[#allocation2] sm:$0xf] %vm357_vm6, %v356_v30 }
 0x146   : > { %372 = sbr.rel (%p543_p7) target bundleno = 779 (0x30b), region = 44 }
 0x147   : > { %v366_v12 = vpop.xlane.xlu0 %365 }
 0x148   : > { %v367_v32 = vadd.f32 %v366_v12, %v359_v31 }
 0x14a   : > { %368 = vst.msk [vmem:[#allocation3] sm:$0xf] %vm357_vm6, %v367_v32 }
 0x14b   : > { %v373_v17 = vld [vmem:[#allocation2] sm:$0xf]  ;;  %vm419_vm8 = vcmask 0  }
 0x14c   : > { %v375_v33 = vsel %vm357_vm6, %v373_v17, 0.0 }
 0x14d   : > { %376 = vadd.xlane.f32.xlu0 %v375_v33 }
 0x151   : > { %v374_v46 = vld [vmem:[#allocation3] sm:$0xf] }
 0x1d6   : > { %v377_v34 = vpop.xlane.xlu0 %376 }
 0x1d7   : > { %v378_v35 = vrot.slane %v377_v34, 4 }
 0x1d9   : > { %v379_v36 = vadd.f32 %v378_v35, %v377_v34 }
 0x1db   : > { %v380_v37 = vrot.slane %v379_v36, 2 }
 0x1dd   : > { %v381_v38 = vadd.f32 %v380_v37, %v379_v36 }
 0x1df   : > { %v382_v39 = vrot.slane %v381_v38, 1 }
 0x1e1   : > { %v383_v40 = vadd.f32 %v382_v39, %v381_v38 }
 0x1e3   : > { %548 = vpush %v383_v40 }
 0x214   : > { %s549_s7 = spop %548 }
 0x215   : > { %v385_v41 = vstv %s549_s7 }
 0x216   : > { %629 = vrcp.f32 %v385_v41 }
 0x223   : > { %v630_v42 = vpop.eup %629 }
 0x224   : > { %v387_v43 = vmul.f32 %v630_v42, %v373_v17 }
 0x226   : > { %vm388_vm7 = vcmp.ne.f32.partialorder %v387_v43, 0.0  ;;  %v389_v44 = vsub.f32 1.0, %v387_v43 }
 0x228   : > { %v390_v45 = vsel %vm388_vm7, %v389_v44, 0.0 }
 0x229   : > { %v391_v47 = vadd.f32 1.0, %v390_v45 }
 0x22b   : > { %v404_v48 = vmul.f32 %v391_v47, %v373_v17  ;;  %v392_v49 = vmul.f32 %v391_v47, %v374_v46 }
 0x22d   : > { %v405_v50 = vsel %vm357_vm6, %v404_v48, 0.0  ;;  %v393_v51 = vsel %vm357_vm6, %v392_v49, 0.0 }
 0x22e   : > { %406 = vadd.xlane.f32.xlu1 %v405_v50  ;;  %394 = vadd.xlane.f32.xlu0 %v393_v51 }
 0x2b7   : > { %v407_v52 = vpop.xlane.xlu1 %406  ;;  %v395_v53 = vpop.xlane.xlu0 %394 }
 0x2b8   : > { %v408_v54 = vrot.slane %v407_v52, 4  ;;  %v396_v55 = vrot.slane %v395_v53, 4 }
 0x2ba   : > { %v409_v56 = vadd.f32 %v408_v54, %v407_v52  ;;  %v397_v57 = vadd.f32 %v396_v55, %v395_v53 }
 0x2bc   : > { %v410_v58 = vrot.slane %v409_v56, 2  ;;  %v398_v59 = vrot.slane %v397_v57, 2 }
 0x2be   : > { %v411_v60 = vadd.f32 %v410_v58, %v409_v56  ;;  %v399_v61 = vadd.f32 %v398_v59, %v397_v57 }
 0x2c0   : > { %v400_v62 = vrot.slane %v399_v61, 1  ;;  %v412_v63 = vrot.slane %v411_v60, 1 }
 0x2c2   : > { %v401_v0 = vadd.f32 %v400_v62, %v399_v61  ;;  %v413_v1 = vadd.f32 %v412_v63, %v411_v60 }
 0x2c4   : > { %550 = vpush %v401_v0 }
 0x2c5   : > { %552 = vpush %v413_v1 }
 0x2f5   : > { %s551_s12 = spop %550 }
 0x2f6   : > { %s553_s9 = spop %552  ;;  %v403_v4 = vstv %s551_s12 }
 0x2f7   : > { %v415_v2 = vstv %s553_s9 }
 0x2f8   : > { %631 = vrcp.f32 %v415_v2 }
 0x305   : > { %v632_v3 = vpop.eup %631 }
 0x306   : > { %v417_v5 = vmul.f32 %v632_v3, %v403_v4 }
 0x308   : > { %v418_v6 = vsub.f32 0.0, %v417_v5 }
 0x30a   : > { %420 = vst.msk [vmem:[%s236_s6] sm:$0x1] %vm419_vm8, %v418_v6 }
 0x30b PF: > { %s18_s16 = sadd.s32 1, %s755_s16   ;;  %s1004_s9 = smov %s731_s10 }
 0x30c   : > { %p15_p3 = scmp.ge.s32.totalorder %s18_s16, 6   ;;  %s1005_s10 = smov %s735_s11 }
 0x30d   : > { %s1006_s11 = smov %s840_s26  ;;  %s1007_s12 = smov %s747_s14 }
 0x30e   : > { %s1008_s13 = smov %s751_s15  ;;  %s1009_s14 = smov %s1012_s17 }
 0x30f   : > { %s1010_s15 = smov %s1016_s18  ;;  %17 = sbr.rel (!%p15_p3) target bundleno = 7 (0x7), region = 89 }
 0x314   :  { %438 = vsyncpa [#allocation5], 1 }
 0x315   :  { %440 = vsyncpa [#allocation5 + $0x1], 1 }
 0x316   :  { %441 = vsyncpa [#allocation7], 1 }
 0x317   :  { %443 = vsyncpa [#allocation7 + $0x1], 1 }

</bundles_post_ra>
